<compile_context>
chip_gen: v7x
topology: tpu7x:2x2x1
jax: 0.10.0
libtpu: 0.0.40
codegen_flags: <defaults>
</compile_context>

<pallas_src>
import numpy as np

import jax
import jax.numpy as jnp
from jax import lax
from jax.experimental import pallas as pl
from jax.experimental.pallas import tpu as pltpu


def _mnet_down_kernel(x_ref, nf_ref, nl_ref, w1_ref, w2_ref, b1_ref, b2_ref,
                      o_ref, h1_ref):
    # x_ref : (BH, W*Cin)      [pooled | input] slab (bf16 or f32), lane = w*Cin+c
    # nf_ref/nl_ref : (BH, 1)  per-image "not first/last row" masks (f32 0/1)
    # w1_ref: (3, W*Cin, W*Cout)   banded conv1 weights (bf16)
    # w2_ref: (3, W*Cout, W*Cout)  banded conv2 weights (bf16)
    # b1_ref/b2_ref : (1, W*Cout)  biases tiled across W (f32)
    # o_ref : (BH, W*Cout)     lane-dense output slab (f32)
    # h1_ref: (BH, W*Cout)     f32 VMEM scratch for the conv1 activation
    f32 = jnp.float32
    bf16 = jnp.bfloat16
    BH = o_ref.shape[0]

    def shifted(ref, dy):
        # result[r] = ref[r + dy - 1] within each image, zero at image borders
        # (the dy tap of a 3x3 "SAME" conv).  Roll = XLU, mask = VPU; both
        # slots are otherwise idle, so the shift is essentially free.
        v = ref[...].astype(f32)
        if dy == 1:
            return v
        if dy == 0:
            return pltpu.roll(v, 1, 0) * nf_ref[...]        # result[r] = v[r-1]
        return pltpu.roll(v, BH - 1, 0) * nl_ref[...]       # result[r] = v[r+1]

    # ---- conv1 (3x3, pad 1) + bias + ReLU; accumulate in the VMEM scratch ----
    h1_ref[...] = jnp.zeros_like(h1_ref)
    for dy in range(3):
        h1_ref[...] += jnp.dot(shifted(x_ref, dy).astype(bf16), w1_ref[dy],
                               preferred_element_type=f32)
    h1_ref[...] = jnp.maximum(h1_ref[...] + b1_ref[...], 0.0)

    # ---- conv2 (3x3, pad 1) + bias + ReLU; accumulate directly into o_ref ----
    o_ref[...] = jnp.zeros_like(o_ref)
    for dy in range(3):
        o_ref[...] += jnp.dot(shifted(h1_ref, dy).astype(bf16), w2_ref[dy],
                              preferred_element_type=f32)
    o_ref[...] = jnp.maximum(o_ref[...] + b2_ref[...], 0.0)


def _band_weights(w_hwio, W):
    """(3, 3, Cg, Cout) HWIO weights -> (3, W*Cg, W*Cout) banded matrices.

    band[dy][wi*Cg + c, w*Cout + co] = w[dy, dx, c, co] where wi = w + dx - 1,
    zero when wi falls outside [0, W): folds the dx taps, the channel mixing
    and the width zero-padding into a single matmul per dy.
    """
    mats = []
    for dy in range(3):
        m = None
        for dx in range(3):
            shift = jnp.eye(W, k=-(dx - 1), dtype=jnp.float32)  # [wi,w]=1 iff wi=w+dx-1
            term = jnp.kron(shift, w_hwio[dy, dx].astype(jnp.float32))
            m = term if m is None else m + term
        mats.append(m)
    return jnp.stack(mats)


def mnet_down_forward(inputs0, x1, params, *, down_factor, is_maxpool):
    """Pallas forward of mnetDown.

    inputs0: (N, C0, H0, W0) NCHW; x1: (N, C1, H, W) with H = H0//d, W = W0//d.
    Returns (N, Cout, H, W).
    """
    d = down_factor
    N, C0, H0, W0 = inputs0.shape
    _, C1, H, W = x1.shape
    assert H0 == H * d and W0 == W * d
    Cin, Cout = params["w1"].shape[2], params["w1"].shape[3]
    assert Cin == C0 + C1
    assert H % 8 == 0, "per-image row count must be a multiple of 8 sublanes"

    f32 = jnp.float32
    bf16 = jnp.bfloat16

    # ---- pooling + channel concat + row-slab layout (XLA glue; the kernel
    # streams only the pooled, concatenated slab -- per the perf review) ----
    x0 = jnp.transpose(inputs0, (0, 2, 3, 1)).astype(f32)               # NHWC
    if is_maxpool:
        pooled = lax.reduce_window(x0, -jnp.inf, lax.max,
                                   (1, d, d, 1), (1, d, d, 1), "VALID")
    else:
        pooled = lax.reduce_window(x0, 0.0, lax.add,
                                   (1, d, d, 1), (1, d, d, 1), "VALID") / float(d * d)
    x1n = jnp.transpose(x1, (0, 2, 3, 1)).astype(f32)
    x_rows = jnp.concatenate([pooled, x1n], axis=-1).reshape(N * H, W * Cin)

    # ---- images per grid step: target ~256 MXU rows, keep >= 2 grid steps
    # (two v7x TensorCores), and make B a divisor of N ----
    B = max(1, min(N, max(1, 256 // H)))
    if N >= 2:
        B = min(B, -(-N // 2))
    while N % B:
        B -= 1
    BH = B * H
    grid = (N // B,)

    # streamed activations in bf16 when the row block allows 16-row packing
    x_dtype = bf16 if BH % 16 == 0 else f32
    x_rows = x_rows.astype(x_dtype)

    # ---- weights: banded, bf16 for MXU-native rate and half the VMEM ----
    w1b = _band_weights(params["w1"].astype(f32), W).astype(bf16)   # (3, W*Cin, W*Cout)
    w2b = _band_weights(params["w2"].astype(f32), W).astype(bf16)   # (3, W*Cout, W*Cout)
    b1r = jnp.tile(params["b1"].astype(f32), W).reshape(1, W * Cout)
    b2r = jnp.tile(params["b2"].astype(f32), W).reshape(1, W * Cout)

    # per-image border masks for the dy = -1 / +1 row taps (same every step)
    rows = np.arange(BH)
    not_first = jnp.asarray((rows % H != 0)[:, None].astype(np.float32))      # (BH,1)
    not_last = jnp.asarray((rows % H != H - 1)[:, None].astype(np.float32))   # (BH,1)

    def const_spec(shape):            # whole-array block, identical every step
        return pl.BlockSpec(shape, lambda i: (0,) * len(shape))

    # ---- explicit VMEM budget from the actual footprint (2x for the default
    # double-buffered blocks) plus headroom, capped at the v7x-safe 64 MiB ----
    x_esize = 2 if x_dtype == bf16 else 4
    blk_bytes = (BH * W * Cin * x_esize              # streamed activation slab
                 + BH * W * Cout * 4                 # output block
                 + 2 * BH * 4                        # masks
                 + 3 * W * Cin * W * Cout * 2        # banded w1 (bf16)
                 + 3 * W * Cout * W * Cout * 2       # banded w2 (bf16)
                 + 2 * W * Cout * 4)                 # biases
    vmem_limit = int(min(2 * blk_bytes + BH * W * Cout * 4 + (8 << 20),
                         64 * 1024 * 1024))

    out_rows = pl.pallas_call(
        _mnet_down_kernel,
        out_shape=jax.ShapeDtypeStruct((N * H, W * Cout), f32),
        grid=grid,
        in_specs=[
            pl.BlockSpec((BH, W * Cin), lambda i: (i, 0)),   # [pooled | input] slab
            const_spec((BH, 1)),                             # not-first-row mask
            const_spec((BH, 1)),                             # not-last-row mask
            const_spec((3, W * Cin, W * Cout)),              # conv1 banded weights
            const_spec((3, W * Cout, W * Cout)),             # conv2 banded weights
            const_spec((1, W * Cout)),                       # bias1 (tiled over W)
            const_spec((1, W * Cout)),                       # bias2
        ],
        out_specs=pl.BlockSpec((BH, W * Cout), lambda i: (i, 0)),  # lane-dense output
        scratch_shapes=[pltpu.VMEM((BH, W * Cout), f32)],          # h1 scratch
        compiler_params=pltpu.CompilerParams(
            dimension_semantics=("parallel",),
            vmem_limit_bytes=vmem_limit),
    )(x_rows, not_first, not_last, w1b, w2b, b1r, b2r)

    out = out_rows.reshape(N, H, W, Cout)
    return jnp.transpose(out, (0, 3, 1, 2))                         # NHWC -> NCHW


def ref_forward(inputs0, x1, params, *, down_factor, is_maxpool):
    """Pure-JAX (XLA, f32) reference for correctness checking."""
    d = down_factor
    x0 = jnp.transpose(inputs0, (0, 2, 3, 1)).astype(jnp.float32)
    if is_maxpool:
        pooled = lax.reduce_window(x0, -jnp.inf, lax.max,
                                   (1, d, d, 1), (1, d, d, 1), "VALID")
    else:
        pooled = lax.reduce_window(x0, 0.0, lax.add,
                                   (1, d, d, 1), (1, d, d, 1), "VALID") / float(d * d)
    x1n = jnp.transpose(x1, (0, 2, 3, 1)).astype(jnp.float32)
    x = jnp.concatenate([pooled, x1n], axis=-1)

    def conv_relu(inp, w, b):
        y = lax.conv_general_dilated(inp, w.astype(jnp.float32), (1, 1), "SAME",
                                     dimension_numbers=("NHWC", "HWIO", "NHWC"))
        return jax.nn.relu(y + b.reshape(1, 1, 1, -1))

    y = conv_relu(x, params["w1"], params["b1"])
    y = conv_relu(y, params["w2"], params["b2"])
    return jnp.transpose(y, (0, 3, 1, 2))


if __name__ == "__main__":
    # mnetDown(in_size=4, out_size=8, down_factor=2, is_maxpool=True):
    # inputs0: (2, 2, 32, 32), input: (2, 2, 16, 16) -> output (2, 8, 16, 16).
    N, C0, C1, Cout = 2, 2, 2, 8
    H, W, d = 16, 16, 2
    is_maxpool = True
    Cin = C0 + C1

    key = jax.random.PRNGKey(0)
    k = jax.random.split(key, 6)
    params = {
        "w1": 0.2 * jax.random.normal(k[0], (3, 3, Cin, Cout), jnp.float32),
        "b1": 0.1 * jax.random.normal(k[1], (Cout,), jnp.float32),
        "w2": 0.2 * jax.random.normal(k[2], (3, 3, Cout, Cout), jnp.float32),
        "b2": 0.1 * jax.random.normal(k[3], (Cout,), jnp.float32),
    }
    inputs0 = jax.random.normal(k[4], (N, C0, H * d, W * d), jnp.float32)
    x1 = jax.random.normal(k[5], (N, C1, H, W), jnp.float32)

    out = jax.block_until_ready(
        mnet_down_forward(inputs0, x1, params, down_factor=d, is_maxpool=is_maxpool))
    ref = jax.block_until_ready(
        ref_forward(inputs0, x1, params, down_factor=d, is_maxpool=is_maxpool))

    assert out.shape == (N, Cout, H, W), out.shape
    err = float(jnp.max(jnp.abs(out - ref)))
    scale = float(jnp.max(jnp.abs(ref)))
    # bf16 MXU operands -> tolerance normalized by the output magnitude.
    assert err <= 2e-2 * max(1.0, scale), (err, scale)
    print("KERNEL_OK")
</pallas_src>

<mosaic_0001>
module attributes {stable_mosaic.version = 11 : i64} {
  func.func @_mnet_down_kernel(%arg0: i32, %arg1: memref<16x64xbf16, #tpu.memory_space<vmem>>, %arg2: memref<16x1xf32, #tpu.memory_space<vmem>>, %arg3: memref<16x1xf32, #tpu.memory_space<vmem>>, %arg4: memref<3x64x128xbf16, #tpu.memory_space<vmem>>, %arg5: memref<3x128x128xbf16, #tpu.memory_space<vmem>>, %arg6: memref<1x128xf32, #tpu.memory_space<vmem>>, %arg7: memref<1x128xf32, #tpu.memory_space<vmem>>, %arg8: memref<16x128xf32, #tpu.memory_space<vmem>>, %arg9: memref<16x128xf32, #tpu.memory_space<vmem>>) attributes {dimension_semantics = [#tpu.dimension_semantics<parallel>], iteration_bounds = array<i64: 2>, scalar_prefetch = 0 : i64, scratch_operands = 1 : i64, tpu.core_type = #tpu.core_type<tc>, window_params = [{transform_indices = @transform_0, window_bounds = array<i64: 16, 64>}, {pipeline_mode = #tpu.pipeline_mode<synchronous>, transform_indices = @transform_1, window_bounds = array<i64: 16, 1>}, {pipeline_mode = #tpu.pipeline_mode<synchronous>, transform_indices = @transform_2, window_bounds = array<i64: 16, 1>}, {pipeline_mode = #tpu.pipeline_mode<synchronous>, transform_indices = @transform_3, window_bounds = array<i64: 3, 64, 128>}, {pipeline_mode = #tpu.pipeline_mode<synchronous>, transform_indices = @transform_4, window_bounds = array<i64: 3, 128, 128>}, {pipeline_mode = #tpu.pipeline_mode<synchronous>, transform_indices = @transform_5, window_bounds = array<i64: 1, 128>}, {pipeline_mode = #tpu.pipeline_mode<synchronous>, transform_indices = @transform_6, window_bounds = array<i64: 1, 128>}, {transform_indices = @transform_7, window_bounds = array<i64: 16, 128>}]} {
    %cst = arith.constant 0.000000e+00 : f32
    %0 = vector.broadcast %cst : f32 to vector<16x128xf32>
    %c0 = arith.constant 0 : index
    %c0_0 = arith.constant 0 : index
    %1 = vector.load %arg9[%c0, %c0_0] : memref<16x128xf32, #tpu.memory_space<vmem>>, vector<16x128xf32>
    tpu.vector_store %arg9[%c0, %c0_0], %0 {strides = array<i32>} : memref<16x128xf32, #tpu.memory_space<vmem>>, vector<16x128xf32>,
    %c0_1 = arith.constant 0 : index
    %c0_2 = arith.constant 0 : index
    %2 = vector.load %arg9[%c0_1, %c0_2] : memref<16x128xf32, #tpu.memory_space<vmem>>, vector<16x128xf32>
    %c0_3 = arith.constant 0 : index
    %c0_4 = arith.constant 0 : index
    %3 = vector.load %arg1[%c0_3, %c0_4] : memref<16x64xbf16, #tpu.memory_space<vmem>>, vector<16x64xbf16>
    %4 = arith.extf %3 : vector<16x64xbf16> to vector<16x64xf32>
    %c1_i32 = arith.constant 1 : i32
    %5 = tpu.dynamic_rotate %4 by %c1_i32 dim 0 : vector<16x64xf32>, i32 -> vector<16x64xf32>
    %c0_5 = arith.constant 0 : index
    %c0_6 = arith.constant 0 : index
    %6 = vector.load %arg2[%c0_5, %c0_6] : memref<16x1xf32, #tpu.memory_space<vmem>>, vector<16x1xf32>
    %7 = vector.broadcast %6 : vector<16x1xf32> to vector<16x64xf32>
    %8 = arith.mulf %5, %7 : vector<16x64xf32>
    %9 = arith.truncf %8 : vector<16x64xf32> to vector<16x64xbf16>
    %c0_7 = arith.constant 0 : index
    %c0_8 = arith.constant 0 : index
    %c0_9 = arith.constant 0 : index
    %10 = vector.load %arg4[%c0_7, %c0_8, %c0_9] : memref<3x64x128xbf16, #tpu.memory_space<vmem>>, vector<1x64x128xbf16>
    %11 = vector.shape_cast %10 : vector<1x64x128xbf16> to vector<64x128xbf16>
    %cst_10 = arith.constant dense<0.000000e+00> : vector<16x128xf32>
    %12 = tpu.matmul %9, %11, %cst_10 {dimension_numbers = #tpu.dot_dimension_numbers<[1], [0], [0], [1], [0, 0, 1, 1], [], []>} : vector<16x64xbf16>, vector<64x128xbf16>, vector<16x128xf32> -> vector<16x128xf32>
    %13 = arith.addf %2, %12 : vector<16x128xf32>
    %c0_11 = arith.constant 0 : index
    %c0_12 = arith.constant 0 : index
    %14 = vector.load %arg9[%c0_11, %c0_12] : memref<16x128xf32, #tpu.memory_space<vmem>>, vector<16x128xf32>
    tpu.vector_store %arg9[%c0_11, %c0_12], %13 {strides = array<i32>} : memref<16x128xf32, #tpu.memory_space<vmem>>, vector<16x128xf32>,
    %c0_13 = arith.constant 0 : index
    %c0_14 = arith.constant 0 : index
    %15 = vector.load %arg9[%c0_13, %c0_14] : memref<16x128xf32, #tpu.memory_space<vmem>>, vector<16x128xf32>
    %c0_15 = arith.constant 0 : index
    %c0_16 = arith.constant 0 : index
    %16 = vector.load %arg1[%c0_15, %c0_16] : memref<16x64xbf16, #tpu.memory_space<vmem>>, vector<16x64xbf16>
    %17 = arith.extf %16 : vector<16x64xbf16> to vector<16x64xf32>
    %18 = arith.truncf %17 : vector<16x64xf32> to vector<16x64xbf16>
    %c1 = arith.constant 1 : index
    %c0_17 = arith.constant 0 : index
    %c0_18 = arith.constant 0 : index
    %19 = vector.load %arg4[%c1, %c0_17, %c0_18] : memref<3x64x128xbf16, #tpu.memory_space<vmem>>, vector<1x64x128xbf16>
    %20 = vector.shape_cast %19 : vector<1x64x128xbf16> to vector<64x128xbf16>
    %cst_19 = arith.constant dense<0.000000e+00> : vector<16x128xf32>
    %21 = tpu.matmul %18, %20, %cst_19 {dimension_numbers = #tpu.dot_dimension_numbers<[1], [0], [0], [1], [0, 0, 1, 1], [], []>} : vector<16x64xbf16>, vector<64x128xbf16>, vector<16x128xf32> -> vector<16x128xf32>
    %22 = arith.addf %15, %21 : vector<16x128xf32>
    %c0_20 = arith.constant 0 : index
    %c0_21 = arith.constant 0 : index
    %23 = vector.load %arg9[%c0_20, %c0_21] : memref<16x128xf32, #tpu.memory_space<vmem>>, vector<16x128xf32>
    tpu.vector_store %arg9[%c0_20, %c0_21], %22 {strides = array<i32>} : memref<16x128xf32, #tpu.memory_space<vmem>>, vector<16x128xf32>,
    %c0_22 = arith.constant 0 : index
    %c0_23 = arith.constant 0 : index
    %24 = vector.load %arg9[%c0_22, %c0_23] : memref<16x128xf32, #tpu.memory_space<vmem>>, vector<16x128xf32>
    %c0_24 = arith.constant 0 : index
    %c0_25 = arith.constant 0 : index
    %25 = vector.load %arg1[%c0_24, %c0_25] : memref<16x64xbf16, #tpu.memory_space<vmem>>, vector<16x64xbf16>
    %26 = arith.extf %25 : vector<16x64xbf16> to vector<16x64xf32>
    %c15_i32 = arith.constant 15 : i32
    %27 = tpu.dynamic_rotate %26 by %c15_i32 dim 0 : vector<16x64xf32>, i32 -> vector<16x64xf32>
    %c0_26 = arith.constant 0 : index
    %c0_27 = arith.constant 0 : index
    %28 = vector.load %arg3[%c0_26, %c0_27] : memref<16x1xf32, #tpu.memory_space<vmem>>, vector<16x1xf32>
    %29 = vector.broadcast %28 : vector<16x1xf32> to vector<16x64xf32>
    %30 = arith.mulf %27, %29 : vector<16x64xf32>
    %31 = arith.truncf %30 : vector<16x64xf32> to vector<16x64xbf16>
    %c2 = arith.constant 2 : index
    %c0_28 = arith.constant 0 : index
    %c0_29 = arith.constant 0 : index
    %32 = vector.load %arg4[%c2, %c0_28, %c0_29] : memref<3x64x128xbf16, #tpu.memory_space<vmem>>, vector<1x64x128xbf16>
    %33 = vector.shape_cast %32 : vector<1x64x128xbf16> to vector<64x128xbf16>
    %cst_30 = arith.constant dense<0.000000e+00> : vector<16x128xf32>
    %34 = tpu.matmul %31, %33, %cst_30 {dimension_numbers = #tpu.dot_dimension_numbers<[1], [0], [0], [1], [0, 0, 1, 1], [], []>} : vector<16x64xbf16>, vector<64x128xbf16>, vector<16x128xf32> -> vector<16x128xf32>
    %35 = arith.addf %24, %34 : vector<16x128xf32>
    %c0_31 = arith.constant 0 : index
    %c0_32 = arith.constant 0 : index
    %36 = vector.load %arg9[%c0_31, %c0_32] : memref<16x128xf32, #tpu.memory_space<vmem>>, vector<16x128xf32>
    tpu.vector_store %arg9[%c0_31, %c0_32], %35 {strides = array<i32>} : memref<16x128xf32, #tpu.memory_space<vmem>>, vector<16x128xf32>,
    %c0_33 = arith.constant 0 : index
    %c0_34 = arith.constant 0 : index
    %37 = vector.load %arg9[%c0_33, %c0_34] : memref<16x128xf32, #tpu.memory_space<vmem>>, vector<16x128xf32>
    %c0_35 = arith.constant 0 : index
    %c0_36 = arith.constant 0 : index
    %38 = vector.load %arg6[%c0_35, %c0_36] : memref<1x128xf32, #tpu.memory_space<vmem>>, vector<1x128xf32>
    %39 = vector.broadcast %38 : vector<1x128xf32> to vector<16x128xf32>
    %40 = arith.addf %37, %39 : vector<16x128xf32>
    %cst_37 = arith.constant 0.000000e+00 : f32
    %41 = vector.broadcast %cst_37 : f32 to vector<16x128xf32>
    %42 = arith.maximumf %40, %41 : vector<16x128xf32>
    %c0_38 = arith.constant 0 : index
    %c0_39 = arith.constant 0 : index
    %43 = vector.load %arg9[%c0_38, %c0_39] : memref<16x128xf32, #tpu.memory_space<vmem>>, vector<16x128xf32>
    tpu.vector_store %arg9[%c0_38, %c0_39], %42 {strides = array<i32>} : memref<16x128xf32, #tpu.memory_space<vmem>>, vector<16x128xf32>,
    %cst_40 = arith.constant 0.000000e+00 : f32
    %44 = vector.broadcast %cst_40 : f32 to vector<16x128xf32>
    %c0_41 = arith.constant 0 : index
    %c0_42 = arith.constant 0 : index
    %45 = vector.load %arg8[%c0_41, %c0_42] : memref<16x128xf32, #tpu.memory_space<vmem>>, vector<16x128xf32>
    tpu.vector_store %arg8[%c0_41, %c0_42], %44 {strides = array<i32>} : memref<16x128xf32, #tpu.memory_space<vmem>>, vector<16x128xf32>,
    %c0_43 = arith.constant 0 : index
    %c0_44 = arith.constant 0 : index
    %46 = vector.load %arg8[%c0_43, %c0_44] : memref<16x128xf32, #tpu.memory_space<vmem>>, vector<16x128xf32>
    %c0_45 = arith.constant 0 : index
    %c0_46 = arith.constant 0 : index
    %47 = vector.load %arg9[%c0_45, %c0_46] : memref<16x128xf32, #tpu.memory_space<vmem>>, vector<16x128xf32>
    %c1_i32_47 = arith.constant 1 : i32
    %48 = tpu.dynamic_rotate %47 by %c1_i32_47 dim 0 : vector<16x128xf32>, i32 -> vector<16x128xf32>
    %c0_48 = arith.constant 0 : index
    %c0_49 = arith.constant 0 : index
    %49 = vector.load %arg2[%c0_48, %c0_49] : memref<16x1xf32, #tpu.memory_space<vmem>>, vector<16x1xf32>
    %50 = vector.broadcast %49 : vector<16x1xf32> to vector<16x128xf32>
    %51 = arith.mulf %48, %50 : vector<16x128xf32>
    %52 = arith.truncf %51 : vector<16x128xf32> to vector<16x128xbf16>
    %c0_50 = arith.constant 0 : index
    %c0_51 = arith.constant 0 : index
    %c0_52 = arith.constant 0 : index
    %53 = vector.load %arg5[%c0_50, %c0_51, %c0_52] : memref<3x128x128xbf16, #tpu.memory_space<vmem>>, vector<1x128x128xbf16>
    %54 = vector.shape_cast %53 : vector<1x128x128xbf16> to vector<128x128xbf16>
    %cst_53 = arith.constant dense<0.000000e+00> : vector<16x128xf32>
    %55 = tpu.matmul %52, %54, %cst_53 {dimension_numbers = #tpu.dot_dimension_numbers<[1], [0], [0], [1], [0, 0, 1, 1], [], []>} : vector<16x128xbf16>, vector<128x128xbf16>, vector<16x128xf32> -> vector<16x128xf32>
    %56 = arith.addf %46, %55 : vector<16x128xf32>
    %c0_54 = arith.constant 0 : index
    %c0_55 = arith.constant 0 : index
    %57 = vector.load %arg8[%c0_54, %c0_55] : memref<16x128xf32, #tpu.memory_space<vmem>>, vector<16x128xf32>
    tpu.vector_store %arg8[%c0_54, %c0_55], %56 {strides = array<i32>} : memref<16x128xf32, #tpu.memory_space<vmem>>, vector<16x128xf32>,
    %c0_56 = arith.constant 0 : index
    %c0_57 = arith.constant 0 : index
    %58 = vector.load %arg8[%c0_56, %c0_57] : memref<16x128xf32, #tpu.memory_space<vmem>>, vector<16x128xf32>
    %c0_58 = arith.constant 0 : index
    %c0_59 = arith.constant 0 : index
    %59 = vector.load %arg9[%c0_58, %c0_59] : memref<16x128xf32, #tpu.memory_space<vmem>>, vector<16x128xf32>
    %60 = arith.truncf %59 : vector<16x128xf32> to vector<16x128xbf16>
    %c1_60 = arith.constant 1 : index
    %c0_61 = arith.constant 0 : index
    %c0_62 = arith.constant 0 : index
    %61 = vector.load %arg5[%c1_60, %c0_61, %c0_62] : memref<3x128x128xbf16, #tpu.memory_space<vmem>>, vector<1x128x128xbf16>
    %62 = vector.shape_cast %61 : vector<1x128x128xbf16> to vector<128x128xbf16>
    %cst_63 = arith.constant dense<0.000000e+00> : vector<16x128xf32>
    %63 = tpu.matmul %60, %62, %cst_63 {dimension_numbers = #tpu.dot_dimension_numbers<[1], [0], [0], [1], [0, 0, 1, 1], [], []>} : vector<16x128xbf16>, vector<128x128xbf16>, vector<16x128xf32> -> vector<16x128xf32>
    %64 = arith.addf %58, %63 : vector<16x128xf32>
    %c0_64 = arith.constant 0 : index
    %c0_65 = arith.constant 0 : index
    %65 = vector.load %arg8[%c0_64, %c0_65] : memref<16x128xf32, #tpu.memory_space<vmem>>, vector<16x128xf32>
    tpu.vector_store %arg8[%c0_64, %c0_65], %64 {strides = array<i32>} : memref<16x128xf32, #tpu.memory_space<vmem>>, vector<16x128xf32>,
    %c0_66 = arith.constant 0 : index
    %c0_67 = arith.constant 0 : index
    %66 = vector.load %arg8[%c0_66, %c0_67] : memref<16x128xf32, #tpu.memory_space<vmem>>, vector<16x128xf32>
    %c0_68 = arith.constant 0 : index
    %c0_69 = arith.constant 0 : index
    %67 = vector.load %arg9[%c0_68, %c0_69] : memref<16x128xf32, #tpu.memory_space<vmem>>, vector<16x128xf32>
    %c15_i32_70 = arith.constant 15 : i32
    %68 = tpu.dynamic_rotate %67 by %c15_i32_70 dim 0 : vector<16x128xf32>, i32 -> vector<16x128xf32>
    %c0_71 = arith.constant 0 : index
    %c0_72 = arith.constant 0 : index
    %69 = vector.load %arg3[%c0_71, %c0_72] : memref<16x1xf32, #tpu.memory_space<vmem>>, vector<16x1xf32>
    %70 = vector.broadcast %69 : vector<16x1xf32> to vector<16x128xf32>
    %71 = arith.mulf %68, %70 : vector<16x128xf32>
    %72 = arith.truncf %71 : vector<16x128xf32> to vector<16x128xbf16>
    %c2_73 = arith.constant 2 : index
    %c0_74 = arith.constant 0 : index
    %c0_75 = arith.constant 0 : index
    %73 = vector.load %arg5[%c2_73, %c0_74, %c0_75] : memref<3x128x128xbf16, #tpu.memory_space<vmem>>, vector<1x128x128xbf16>
    %74 = vector.shape_cast %73 : vector<1x128x128xbf16> to vector<128x128xbf16>
    %cst_76 = arith.constant dense<0.000000e+00> : vector<16x128xf32>
    %75 = tpu.matmul %72, %74, %cst_76 {dimension_numbers = #tpu.dot_dimension_numbers<[1], [0], [0], [1], [0, 0, 1, 1], [], []>} : vector<16x128xbf16>, vector<128x128xbf16>, vector<16x128xf32> -> vector<16x128xf32>
    %76 = arith.addf %66, %75 : vector<16x128xf32>
    %c0_77 = arith.constant 0 : index
    %c0_78 = arith.constant 0 : index
    %77 = vector.load %arg8[%c0_77, %c0_78] : memref<16x128xf32, #tpu.memory_space<vmem>>, vector<16x128xf32>
    tpu.vector_store %arg8[%c0_77, %c0_78], %76 {strides = array<i32>} : memref<16x128xf32, #tpu.memory_space<vmem>>, vector<16x128xf32>,
    %c0_79 = arith.constant 0 : index
    %c0_80 = arith.constant 0 : index
    %78 = vector.load %arg8[%c0_79, %c0_80] : memref<16x128xf32, #tpu.memory_space<vmem>>, vector<16x128xf32>
    %c0_81 = arith.constant 0 : index
    %c0_82 = arith.constant 0 : index
    %79 = vector.load %arg7[%c0_81, %c0_82] : memref<1x128xf32, #tpu.memory_space<vmem>>, vector<1x128xf32>
    %80 = vector.broadcast %79 : vector<1x128xf32> to vector<16x128xf32>
    %81 = arith.addf %78, %80 : vector<16x128xf32>
    %cst_83 = arith.constant 0.000000e+00 : f32
    %82 = vector.broadcast %cst_83 : f32 to vector<16x128xf32>
    %83 = arith.maximumf %81, %82 : vector<16x128xf32>
    %c0_84 = arith.constant 0 : index
    %c0_85 = arith.constant 0 : index
    %84 = vector.load %arg8[%c0_84, %c0_85] : memref<16x128xf32, #tpu.memory_space<vmem>>, vector<16x128xf32>
    tpu.vector_store %arg8[%c0_84, %c0_85], %83 {strides = array<i32>} : memref<16x128xf32, #tpu.memory_space<vmem>>, vector<16x128xf32>,
    return
  }
  func.func @transform_0(%arg0: i32) -> (i32, i32) {
    %c0_i32 = arith.constant 0 : i32
    %c0_i32_0 = arith.constant 0 : i32
    return %arg0, %c0_i32 : i32, i32
  }
  func.func @transform_1(%arg0: i32) -> (i32, i32) {
    %c0_i32 = arith.constant 0 : i32
    %c0_i32_0 = arith.constant 0 : i32
    %c0_i32_1 = arith.constant 0 : i32
    return %c0_i32, %c0_i32_0 : i32, i32
  }
  func.func @transform_2(%arg0: i32) -> (i32, i32) {
    %c0_i32 = arith.constant 0 : i32
    %c0_i32_0 = arith.constant 0 : i32
    %c0_i32_1 = arith.constant 0 : i32
    return %c0_i32, %c0_i32_0 : i32, i32
  }
  func.func @transform_3(%arg0: i32) -> (i32, i32, i32) {
    %c0_i32 = arith.constant 0 : i32
    %c0_i32_0 = arith.constant 0 : i32
    %c0_i32_1 = arith.constant 0 : i32
    %c0_i32_2 = arith.constant 0 : i32
    return %c0_i32, %c0_i32_0, %c0_i32_1 : i32, i32, i32
  }
  func.func @transform_4(%arg0: i32) -> (i32, i32, i32) {
    %c0_i32 = arith.constant 0 : i32
    %c0_i32_0 = arith.constant 0 : i32
    %c0_i32_1 = arith.constant 0 : i32
    %c0_i32_2 = arith.constant 0 : i32
    return %c0_i32, %c0_i32_0, %c0_i32_1 : i32, i32, i32
  }
  func.func @transform_5(%arg0: i32) -> (i32, i32) {
    %c0_i32 = arith.constant 0 : i32
    %c0_i32_0 = arith.constant 0 : i32
    %c0_i32_1 = arith.constant 0 : i32
    return %c0_i32, %c0_i32_0 : i32, i32
  }
  func.func @transform_6(%arg0: i32) -> (i32, i32) {
    %c0_i32 = arith.constant 0 : i32
    %c0_i32_0 = arith.constant 0 : i32
    %c0_i32_1 = arith.constant 0 : i32
    return %c0_i32, %c0_i32_0 : i32, i32
  }
  func.func @transform_7(%arg0: i32) -> (i32, i32) {
    %c0_i32 = arith.constant 0 : i32
    %c0_i32_0 = arith.constant 0 : i32
    return %arg0, %c0_i32 : i32, i32
  }
}

</mosaic_0001>

<bundles_post_ra>
// kernel: tpu_custom_call.1
= control target key start
LH: loop header
LB: loop body
LE: loop exit
PB: predicated region body
PF: predicated region fallthrough
CT: control target
= control target key end

     0   :  { %12 = vsyncpa [#allocation4], 0  ;;  %s1881_s0 = inlined_call_operand.vmem [shape: bf16[32,64], index: 0, kind: input, shape index: {}]   ;;  %s1882_s1 = inlined_call_operand.vmem [shape: f32[16,1], index: 1, kind: input, shape index: {}]   ;;  %s1883_s2 = inlined_call_operand.vmem [shape: f32[16,1], index: 2, kind: input, shape index: {}]   ;;  %s1884_s3 = inlined_call_operand.hbm [shape: bf16[3,64,128], index: 3, kind: input, shape index: {}]   ;;  %s1885_s4 = inlined_call_operand.hbm [shape: bf16[3,128,128], index: 4, kind: input, shape index: {}]   ;;  %s1886_s5 = inlined_call_operand.vmem [shape: f32[1,128], index: 5, kind: input, shape index: {}]   ;;  %s1887_s6 = inlined_call_operand.vmem [shape: f32[1,128], index: 6, kind: input, shape index: {}]   ;;  %s1888_s7 = inlined_call_operand.hbm [shape: f32[32,128], index: 7, kind: output, shape index: {}]  }
   0x1   :  { %13 = vsyncpa [#allocation7], 0 }
   0x2   :  { %14 = vsyncpa [#allocation5], 0 }
   0x3   :  { %16 = vsyncpa [#allocation5 + $0x1], 0  ;;  %s1618_s24 = smov 0   ;;  %s1620_s25 = smov 0  }
   0x4   :  { %s1622_s26 = smov 0   ;;  %s1624_s27 = smov 0  }
   0x5 LB: > { %s1639_s28 = sadd.s32 4294967295, %s1566_s27   ;;  %s1129_s29 = sadd.s32 4294967294, %s1566_s27   ;;  %s1566_s27 = sphi %s1624_s27, %s1908_s27   ;;  %s1562_s26 = sphi %s1622_s26, %s1907_s26   ;;  %s1558_s25 = sphi %s1620_s25, %s1906_s25   ;;  %s1554_s24 = sphi %s1618_s24, %s1905_s24  }
   0x6   : > { %s1643_s30 = sadd.s32 1, %s1566_s27   ;;  %s181_s8 = sadd.s32 1, %s1562_s26 }
   0x7   : > { %s178_s9 = ssub.s32 %s1566_s27, %s1643_s30  ;;  %p191_p0 = scmp.ne.s32.totalorder %s1562_s26, %s1558_s25 }
   0x8   : > { %p179_p1 = scmp.eq.s32.totalorder %s178_s9, 0  ;;  %p192_p2 = scmp.eq.s32.totalorder %s1639_s28, 1 }
   0x9   : > { %p197_p3 = scmp.ne.s32.totalorder %s1558_s25, %s1554_s24  ;;  %p198_p4 = scmp.eq.s32.totalorder %s1129_s29, 1 }
   0xa   : > { %s1654_s10 = scalar_select %p179_p1, %s1562_s26, %s181_s8  }
   0xb   : > { %p1656_p5 = por %p192_p2, %p191_p0  ;;  %p1660_p6 = por %p198_p4, %p197_p3 }
   0xc   : > { %1892 = sst [smem:[#allocation12_spill]] %s1654_s10  ;;  %p1130_p7 = scmp.ge.s32.totalorder %s1566_s27, 1 }
   0xd   : > { %s1893_s11 = scalar_select %p1656_p5, 1, 0 }
   0xe   : > { %s1894_s12 = scalar_select %p1660_p6, 1, 0 }
   0xf   : > { %p205_p8 = scmp.lt.s32.totalorder %s1566_s27, 3  ;;  %p1889_p9 = scmp.eq.s32.totalorder %s1639_s28, 0 }
  0x10   : > { %s1568_s14 = smov [#allocation3]   ;;  %s1569_s17 = smov [#allocation6]  }
  0x11   : > { %p1667_p10 = pnand %p1130_p7, %p205_p8  ;;  %s223_s15 = sshll.u32 %s1568_s14, 4  ;;  %s224_s15 = int_to_ptr.vmem [resolvable:$true] %s223_s15 }
  0x12   : > { %s236_s18 = sshll.u32 %s1569_s17, 4  ;;  %s1440_s21 = scalar_lea.hbm %s1884_s3, 1536  ;;  %s1679_s18 = int_to_ptr.vmem [resolvable:$true] %s236_s18 }
  0x13   : > { %s1895_s13 = scalar_select %p1667_p10, 1, 0 }
  0x14   : > { %p1344_p11 = pneg %p1667_p10  ;;  %p1441_p13 = scmp.ne.s32.totalorder %s1884_s3, %s1440_s21 }
  0x15   : > { %p1447_p3 = scmp.lt.u32.totalorder %s1440_s21, %s1884_s3 }
  0x16   : > { %p1675_p12 = pnand %p1889_p9, %p1344_p11 }
  0x18   : > { %p1442_p0 = pneg %p1675_p12 }
  0x1a   : > { %p1443_p1 = pnand %p1442_p0, %p1441_p13 }
  0x1c   : > { %p1444_p2 = pneg %p1443_p1 }
  0x1e   : > { %p1449_p4 = pnand %p1447_p3, %p1444_p2 }
  0x20   : > { %1452 = shalt.err (!%p1449_p4)
}
  0x21   : > { %s1453_s9 = scalar_lea.vmem %s224_s15, 1536  ;;  %p1461_p9 = scmp.lt.s32.totalorder %s224_s15, %s224_s15 }
  0x22   : > { %p1454_p7 = scmp.ne.s32.totalorder %s224_s15, %s1453_s9  ;;  %p1462_p6 = scmp.lt.s32.totalorder %s1453_s9, %s1453_s9 }
  0x24   : > { %p1456_p8 = pnand %p1454_p7, %p1442_p0  ;;  %p1463_p5 = por %p1462_p6, %p1461_p9 }
  0x26   : > { %p1457_p11 = pneg %p1456_p8 }
  0x28   : > { %p1464_p10 = pnand %p1463_p5, %p1457_p11 }
  0x2a   : > { %1467 = shalt.err (!%p1464_p10)
}
  0x2b   : > { %s1570_s14 = smov 64   ;;  %s1571_s17 = smov 4  }
  0x2c   : > { %1347 = dma.hbm_to_vmem [thread:$0]  (!%p1675_p12), %s1884_s3, 1536, %s224_s15, [#allocation4], %s1570_s14, %s1570_s14, %s1571_s17  }
  0x2d   : > { %s1468_s23 = scalar_lea.hbm %s1885_s4, 3072 }
  0x2e   : > { %p1469_p13 = scmp.ne.s32.totalorder %s1885_s4, %s1468_s23  ;;  %p1475_p9 = scmp.lt.u32.totalorder %s1468_s23, %s1885_s4 }
  0x30   : > { %p1471_p5 = pnand %p1469_p13, %p1442_p0 }
  0x32   : > { %p1472_p6 = pneg %p1471_p5 }
  0x34   : > { %p1477_p10 = pnand %p1475_p9, %p1472_p6 }
  0x36   : > { %1480 = shalt.err (!%p1477_p10)
}
  0x37   : > { %s1481_s15 = scalar_lea.vmem %s1679_s18, 3072  ;;  %p1489_p4 = scmp.lt.s32.totalorder %s1679_s18, %s1679_s18 }
  0x38   : > { %p1482_p1 = scmp.ne.s32.totalorder %s1679_s18, %s1481_s15  ;;  %p1490_p7 = scmp.lt.s32.totalorder %s1481_s15, %s1481_s15 }
  0x3a   : > { %p1484_p2 = pnand %p1482_p1, %p1442_p0  ;;  %p1491_p8 = por %p1490_p7, %p1489_p4 }
  0x3c   : > { %p1485_p3 = pneg %p1484_p2 }
  0x3e   : > { %p1492_p11 = pnand %p1491_p8, %p1485_p3 }
  0x40   : > { %1495 = shalt.err (!%p1492_p11)
}
  0x41   : > { %1350 = dma.hbm_to_vmem [thread:$0]  (!%p1675_p12), %s1885_s4, 3072, %s1679_s18, [#allocation7], %s1570_s14, %s1570_s14, %s1571_s17  }
  0x42   : > { %p1897_p13 = scmp.ne.s32.totalorder %s1895_s13, 0 }
  0x43   : > { %p1898_p5 = scmp.eq.s32.totalorder (!%p1897_p13), %s1639_s28, 0 }
  0x44   : > { %267 = sbr.rel (%p1897_p13) target bundleno = 729 (0x2d9), region = 48 }
  0x4b   : > { %1541 = dma.done.wait (%p1898_p5), [#allocation4], 1536   ;;  %p1899_p0 = pmov %p1898_p5 }
  0x4d   : > { %1543 = vsyncadd (%p1899_p0), [#allocation4], 4294965760  ;;  %p1900_p6 = pmov %p1899_p0 }
  0x4e   : > { %p1901_p9 = pmov %p1899_p0 }
  0x4f   : > { %1545 = dma.done.wait (%p1900_p6), [#allocation7], 3072  }
  0x50   : > { %1547 = vsyncadd (%p1901_p9), [#allocation7], 4294964224  ;;  %v1572_v0 = vmov 0   ;;  %v1573_v1 = vmov 0.0   ;;  %s1138_s13 = sshll.u32 %s1639_s28, 1  ;;  %v326_v2 = vld [vmem:[%s1882_s1] sm:$0xff]  ;;  %v321_v16 = vlaneseq }
  0x51   : > { %1401 = vset.pattern.permute.xlu0 %v1572_v0  ;;  %1402 = vset.pattern.permute.xlu1 %v1572_v0  ;;  %p304_p12 = scmp.lt.s32.totalorder %s1138_s13, 3  ;;  %v523_v3 = vld [vmem:[%s1883_s2] sm:$0xff]  ;;  %v327_v4 = vld [vmem:[%s1882_s1 + $0x8] sm:$0xff]  ;;  %v1407_v10 = vld [vmem:[#allocation3 + $0x10] sm:$0xff]   ;;  %vm1574_vm0 = vmmov 0   ;;  %vm373_vm1 = vcmask 523264  }
  0x52   : > { %1238 = vmatprep.subr.bf16.mxu0 %v1573_v1  ;;  %1250 = vmatprep.subr.bf16.mxu1 %v1573_v1  ;;  %v524_v5 = vld [vmem:[%s1883_s2 + $0x8] sm:$0xff]  ;;  %v1403_v6 = vld [vmem:[#allocation3] sm:$0xff]   ;;  %v1408_v11 = vld [vmem:[#allocation3 + $0x30] sm:$0xff]   ;;  %v1772_v20 = vshrl.u32 %v321_v16, 7  ;;  %s1187_s17 = sshll.u32 %s1639_s28, 8  ;;  %p1902_p1 = scmp.ne.s32.totalorder %s1893_s11, 0 }
  0x53   : > { %330 = vperm.xlu0 %1401, %v326_v2   ;;  %527 = vperm.xlu1 %1402, %v523_v3   ;;  %s1910_s13 = smov (!%p304_p12, %s1138_s13), 3  ;;  %v1404_v7 = vld [vmem:[#allocation3 + $0x20] sm:$0xff]   ;;  %v1405_v8 = vld [vmem:[#allocation3 + $0x8] sm:$0xff]   ;;  %v1409_v12 = vld [vmem:[#allocation3 + $0x18] sm:$0xff]   ;;  %s1575_s9 = smov [#allocation8]  }
  0x54   : > { %1239 = vmatpush3.bf16.msra.mxu0 %v1403_v6  ;;  %1251 = vmatpush3.bf16.msra.mxu1 %v1404_v7  ;;  %v1406_v9 = vld [vmem:[#allocation3 + $0x28] sm:$0xff]   ;;  %s1139_s29 = sshll.u32 %s1910_s13, 2  ;;  %v1410_v13 = vld [vmem:[#allocation3 + $0x38] sm:$0xff]   ;;  %v1417_v15 = vld [vmem:[#allocation6] sm:$0xff]   ;;  %vm323_vm2 = vcmp.lt.s32.totalorder %v1772_v20, 1  ;;  %vm520_vm3 = vcmp.lt.s32.totalorder %v1772_v20, 7 }
  0x55   : > { %1240 = vmatprep.subr.bf16.mxu0 %v1573_v1  ;;  %1252 = vmatprep.subr.bf16.mxu1 %v1573_v1  ;;  %s307_s15 = scalar_lea.vmem %s1881_s0, %s1139_s29  ;;  %v1412_v29 = vld [vmem:[#allocation3 + $0x40] sm:$0xff]   ;;  %v1413_v31 = vld [vmem:[#allocation3 + $0x48] sm:$0xff]   ;;  %v1414_v35 = vld [vmem:[#allocation3 + $0x50] sm:$0xff]   ;;  %s300_s13 = sand.u32 1, %s1558_s25  }
  0x56   : > { %1246 = vmatprep.mubr.msk.bf16.mxu0 %vm1574_vm0, %v1573_v1  ;;  %1258 = vmatprep.mubr.msk.bf16.mxu1 %vm1574_vm0, %v1573_v1  ;;  %v1411_v14 = vld [vmem:[%s307_s15] sm:$0xff]   ;;  %v1415_v39 = vld [vmem:[#allocation3 + $0x58] sm:$0xff]   ;;  %v1418_v44 = vld [vmem:[#allocation6 + $0x48] sm:$0xff]   ;;  %s1137_s16 = sshll.u32 %s300_s13, 4  ;;  %s1836_s29 = scalar_lea.hbm %s1888_s7, %s1187_s17 }
  0x57   : > { %335 = vperm.xlu0 %1401, %v327_v4   ;;  %532 = vperm.xlu1 %1402, %v524_v5   ;;  %v1189_v17 = vld [vmem:[%s307_s15] sm:$0xff]   ;;  %v1419_v45 = vld [vmem:[#allocation6 + $0x8] sm:$0xff]   ;;  %v1420_v46 = vld [vmem:[#allocation6 + $0x50] sm:$0xff]   ;;  %s302_s20 = scalar_lea.vmem [#allocation8], %s1137_s16  ;;  %s1840_s8 = scalar_lea.sflag [#allocation5], %s300_s13 }
  0x58   : > { %1241 = vmatpush3.bf16.msra.mxu0 %v1405_v8  ;;  %1253 = vmatpush3.bf16.msra.mxu1 %v1406_v9  ;;  %v1190_v18 = vunpack.c.l.bf16 %v1189_v17  ;;  %v1191_v19 = vunpack.c.h.bf16 %v1189_v17  ;;  %v1416_v42 = vld [vmem:[#allocation6 + $0x40] sm:$0xff]   ;;  %v1421_v47 = vld [vmem:[#allocation6 + $0x10] sm:$0xff]   ;;  %v1422_v48 = vld [vmem:[#allocation6 + $0x58] sm:$0xff]   ;;  %s1045_s21 = sshll.u32 %s302_s20, 4  ;;  %s1500_s15 = sshll.u32 %s1575_s9, 4  ;;  %s1838_s21 = int_to_ptr.vmem [resolvable:$true] %s1045_s21  ;;  %s1501_s15 = int_to_ptr.vmem [resolvable:$false] %s1500_s15 }
  0x59   : > { %1242 = vmatprep.subr.bf16.mxu0 %v1573_v1  ;;  %1254 = vmatprep.subr.bf16.mxu1 %v1573_v1  ;;  %v1423_v49 = vld [vmem:[#allocation6 + $0x18] sm:$0xff]   ;;  %v1424_v50 = vld [vmem:[#allocation6 + $0x60] sm:$0xff]   ;;  %v1426_v55 = vld [vmem:[#allocation6 + $0x68] sm:$0xff]   ;;  %s1496_s28 = scalar_lea.vmem %s1838_s21, 256  ;;  %s1502_s10 = scalar_lea.vmem %s1501_s15, 512 }
  0x5a   : > { %v319_v21 = vrot.slane %v1190_v18, 7  ;;  %v320_v22 = vrot.slane %v1191_v19, 7  ;;  %v518_v33 = vrot.slane %v1190_v18, 1  ;;  %v519_v34 = vrot.slane %v1191_v19, 1  ;;  %v1425_v54 = vld [vmem:[#allocation6 + $0x20] sm:$0xff]   ;;  %v1427_v57 = vld [vmem:[#allocation6 + $0x28] sm:$0xff]   ;;  %p1497_p10 = scmp.ne.s32.totalorder %s1838_s21, %s1496_s28  ;;  %p1503_p4 = scmp.lt.s32.totalorder %s1838_s21, %s1501_s15 }
  0x5b   : > { %648 = vperm.xlu0 %1401, %v326_v2   ;;  %653 = vperm.xlu1 %1402, %v327_v4   ;;  %v1428_v58 = vld [vmem:[#allocation6 + $0x70] sm:$0xff]   ;;  %v1430_v60 = vld [vmem:[#allocation6 + $0x78] sm:$0xff]   ;;  %v1156_v6 = vld [vmem:[%s1886_s5] ss:$0 sm:$0xff]  ;;  %p1504_p7 = scmp.lt.s32.totalorder %s1502_s10, %s1496_s28 }
  0x5c   : > { %1243 = vmatpush3.bf16.msra.mxu0 %v1407_v10  ;;  %1255 = vmatpush3.bf16.msra.mxu1 %v1408_v11  ;;  %v325_v24 = vsel %vm323_vm2, %v320_v22, %v319_v21  ;;  %v324_v25 = vsel %vm323_vm2, %v319_v21, %v320_v22  ;;  %v521_v36 = vsel %vm520_vm3, %v518_v33, %v519_v34  ;;  %v1429_v59 = vld [vmem:[#allocation6 + $0x30] sm:$0xff]   ;;  %v1431_v61 = vld [vmem:[#allocation6 + $0x38] sm:$0xff]   ;;  %p1498_p2 = pnand %p1497_p10, %p1902_p1 }
  0x5d   : > { %1244 = vmatprep.subr.bf16.mxu0 %v1573_v1  ;;  %1256 = vmatprep.subr.bf16.mxu1 %v1573_v1  ;;  %v522_v37 = vsel %vm520_vm3, %v519_v34, %v518_v33  ;;  %v1432_v34 = vld [vmem:[#allocation6 + $0x80] sm:$0xff]   ;;  %v1435_v20 = vld [vmem:[#allocation6 + $0x98] sm:$0xff]   ;;  %p1505_p8 = por %p1504_p7, %p1503_p4 }
  0x5e   : > { %p1499_p3 = pneg %p1498_p2 }
  0x5f   : > { %895 = vperm.xlu0 %1401, %v523_v3   ;;  %900 = vperm.xlu1 %1402, %v524_v5  }
  0x60   : > { %1245 = vmatpush3.bf16.msra.mxu0 %v1409_v12  ;;  %1257 = vmatpush3.bf16.msra.mxu1 %v1410_v13  ;;  %p1506_p11 = pnand %p1505_p8, %p1499_p3 }
  0x61   : > { %1262 = vmatprep.subr.bf16.mxu0 %v1573_v1  ;;  %1274 = vmatprep.subr.bf16.mxu1 %v1573_v1 }
  0x63   : > { %1259 = vmatmul.mubr.msk.bf16.vlgmr.msra.gmra.mrb[0].mxu1 %vm373_vm1, %v1411_v14 }
  0x64   : > { %1290 = vmatprep.mubr.msk.bf16.mxu1 %vm1574_vm0, %v1573_v1  ;;  %1275 = vmatpush3.bf16.msra.mxu1 %v1417_v15 }
  0x65   : > { %1276 = vmatprep.subr.bf16.mxu1 %v1573_v1 }
  0x68   : > { %1277 = vmatpush3.bf16.msra.mxu1 %v1419_v45 }
  0x69   : > { %1278 = vmatprep.subr.bf16.mxu1 %v1573_v1 }
  0x6c   : > { %1279 = vmatpush3.bf16.msra.mxu1 %v1421_v47 }
  0x6d   : > { %1280 = vmatprep.subr.bf16.mxu1 %v1573_v1 }
  0x70   : > { %1281 = vmatpush3.bf16.msra.mxu1 %v1423_v49 }
  0x71   : > { %1282 = vmatprep.subr.bf16.mxu1 %v1573_v1 }
  0x74   : > { %1283 = vmatpush3.bf16.msra.mxu1 %v1425_v54 }
  0x75   : > { %1284 = vmatprep.subr.bf16.mxu1 %v1573_v1 }
  0x78   : > { %1285 = vmatpush3.bf16.msra.mxu1 %v1427_v57 }
  0x79   : > { %1286 = vmatprep.subr.bf16.mxu1 %v1573_v1 }
  0x7c   : > { %1287 = vmatpush3.bf16.msra.mxu1 %v1429_v59 }
  0x7d   : > { %1288 = vmatprep.subr.bf16.mxu1 %v1573_v1 }
  0x80   : > { %1289 = vmatpush3.bf16.msra.mxu1 %v1431_v61 }
  0x81   : > { %1314 = vmatprep.subr.bf16.mxu1 %v1573_v1 }
  0xd2   : > { %v331_v23 = vpop.permute.xlu0 %330  ;;  %v528_v32 = vpop.permute.xlu1 %527 }
  0xd3   : > { %v338_v27 = vmul.f32 %v331_v23, %v325_v24  ;;  %v535_v40 = vmul.f32 %v528_v32, %v521_v36 }
  0xd6   : > { %v336_v26 = vpop.permute.xlu0 %335  ;;  %v533_v38 = vpop.permute.xlu1 %532 }
  0xd7   : > { %v339_v28 = vmul.f32 %v336_v26, %v324_v25  ;;  %v536_v41 = vmul.f32 %v533_v38, %v522_v37  ;;  %v1433_v37 = vld [vmem:[#allocation6 + $0x88] sm:$0xff]   ;;  %v1434_v38 = vld [vmem:[#allocation6 + $0x90] sm:$0xff]  }
  0xd9   : > { %v340_v30 = vpack.c.bf16 %v339_v28, %v338_v27  ;;  %v537_v43 = vpack.c.bf16 %v536_v41, %v535_v40  ;;  %v1437_v40 = vld [vmem:[#allocation6 + $0xa8] sm:$0xff]   ;;  %v1438_v41 = vld [vmem:[#allocation6 + $0xb0] sm:$0xff]  }
  0xda   : > { %v649_v13 = vpop.permute.xlu0 %648  ;;  %v654_v14 = vpop.permute.xlu1 %653 }
  0xdb   : > { %1247 = vmatmul.mubr.msk.bf16.vlgmr.msra.gmra.mrb[0].mxu0 %vm373_vm1, %v340_v30 }
  0xdc   : > { %1263 = vmatpush3.bf16.msra.mxu0 %v1412_v29  ;;  %1270 = vmatprep.mubr.msk.bf16.mxu0 %vm1574_vm0, %v1573_v1 }
  0xdd   : > { %1264 = vmatprep.subr.bf16.mxu0 %v1573_v1 }
  0xde   : > { %v896_v24 = vpop.permute.xlu0 %895  ;;  %v901_v25 = vpop.permute.xlu1 %900 }
  0xe0   : > { %1265 = vmatpush3.bf16.msra.mxu0 %v1413_v31 }
  0xe1   : > { %1266 = vmatprep.subr.bf16.mxu0 %v1573_v1 }
  0xe4   : > { %1267 = vmatpush3.bf16.msra.mxu0 %v1414_v35 }
  0xe5   : > { %1268 = vmatprep.subr.bf16.mxu0 %v1573_v1 }
  0xe8   : > { %1269 = vmatpush3.bf16.msra.mxu0 %v1415_v39  ;;  %v1436_v39 = vld [vmem:[#allocation6 + $0xa0] sm:$0xff]  }
  0xe9   : > { %1294 = vmatprep.subr.bf16.mxu0 %v1573_v1 }
  0xeb   : > { %1271 = vmatmul.mubr.msk.bf16.vlgmr.msra.gmra.mrb[4].mxu0 %vm373_vm1, %v537_v43 }
  0xec   : > { %1295 = vmatpush3.bf16.msra.mxu0 %v1416_v42  ;;  %1310 = vmatprep.mubr.msk.bf16.mxu0 %vm1574_vm0, %v1573_v1  ;;  %v1439_v42 = vld [vmem:[#allocation6 + $0xb8] sm:$0xff]  }
  0xed   : > { %1296 = vmatprep.subr.bf16.mxu0 %v1573_v1 }
  0xf0   : > { %1297 = vmatpush3.bf16.msra.mxu0 %v1418_v44 }
  0xf1   : > { %1298 = vmatprep.subr.bf16.mxu0 %v1573_v1 }
  0xf4   : > { %1299 = vmatpush3.bf16.msra.mxu0 %v1420_v46 }
  0xf5   : > { %1300 = vmatprep.subr.bf16.mxu0 %v1573_v1 }
  0xf8   : > { %1301 = vmatpush3.bf16.msra.mxu0 %v1422_v48 }
  0xf9   : > { %1302 = vmatprep.subr.bf16.mxu0 %v1573_v1 }
  0xfc   : > { %1303 = vmatpush3.bf16.msra.mxu0 %v1424_v50 }
  0xfd   : > { %1304 = vmatprep.subr.bf16.mxu0 %v1573_v1 }
 0x100   : > { %1305 = vmatpush3.bf16.msra.mxu0 %v1426_v55 }
 0x101   : > { %1306 = vmatprep.subr.bf16.mxu0 %v1573_v1 }
 0x104   : > { %1307 = vmatpush3.bf16.msra.mxu0 %v1428_v58 }
 0x105   : > { %1308 = vmatprep.subr.bf16.mxu0 %v1573_v1 }
 0x108   : > { %1309 = vmatpush3.bf16.msra.mxu0 %v1430_v60 }
 0x136   : > { %v501_v51 = vpop.f32.mrb[0].mxu1 }
 0x137   : > { %v1260_v52 = vpop.f32.mrb[1].mxu1 }
 0x138   : > { %v504_v53 = vpop.f32.mrb[2].mxu1 }
 0x139   : > { %v1261_v56 = vpop.f32.mrb[3].mxu1 }
 0x1ae   : > { %v411_v62 = vpop.f32.mrb[0].mxu0 }
 0x1af   : > { %v508_v63 = vadd.f32 %v501_v51, %v411_v62  ;;  %v1248_v0 = vpop.f32.mrb[1].mxu0 }
 0x1b0   : > { %v414_v2 = vpop.f32.mrb[2].mxu0 }
 0x1b1   : > { %v509_v3 = vadd.f32 %v504_v53, %v414_v2  ;;  %v1249_v4 = vpop.f32.mrb[3].mxu0 }
 0x1be   : > { %v608_v5 = vpop.f32.mrb[4].mxu0 }
 0x1bf   : > { %v615_v7 = vadd.f32 %v608_v5, %v508_v63  ;;  %v1272_v8 = vpop.f32.mrb[5].mxu0 }
 0x1c0   : > { %v611_v9 = vpop.f32.mrb[6].mxu0 }
 0x1c1   : > { %v628_v10 = vadd.f32 %v1156_v6, %v615_v7  ;;  %v616_v11 = vadd.f32 %v611_v9, %v509_v3  ;;  %v1273_v12 = vpop.f32.mrb[7].mxu0 }
 0x1c3   : > { %v630_v15 = vmax.f32 %v628_v10, 0.0  ;;  %v629_v16 = vadd.f32 %v1156_v6, %v616_v11 }
 0x1c5   : > { %v631_v17 = vmax.f32 %v629_v16, 0.0  ;;  %v640_v18 = vrot.slane %v630_v15, 7  ;;  %v887_v19 = vrot.slane %v630_v15, 1 }
 0x1c7   : > { %v641_v21 = vrot.slane %v631_v17, 7  ;;  %v888_v22 = vrot.slane %v631_v17, 1  ;;  %v772_v23 = vpack.c.bf16 %v631_v17, %v630_v15 }
 0x1c9   : > { %1311 = vmatmul.mubr.bf16.vlgmr.msra.gmra.mrb[8].mxu0 %v772_v23  ;;  %v642_v26 = vsel %vm323_vm2, %v640_v18, %v641_v21  ;;  %v643_v27 = vsel %vm323_vm2, %v641_v21, %v640_v18  ;;  %v889_v28 = vsel %vm520_vm3, %v887_v19, %v888_v22  ;;  %v890_v29 = vsel %vm520_vm3, %v888_v22, %v887_v19 }
 0x1ca   : > { %v656_v30 = vmul.f32 %v649_v13, %v643_v27  ;;  %v657_v31 = vmul.f32 %v654_v14, %v642_v26  ;;  %v903_v32 = vmul.f32 %v896_v24, %v889_v28  ;;  %v904_v33 = vmul.f32 %v901_v25, %v890_v29 }
 0x1cc   : > { %v658_v35 = vpack.c.bf16 %v657_v31, %v656_v30  ;;  %v905_v36 = vpack.c.bf16 %v904_v33, %v903_v32 }
 0x1ce   : > { %1291 = vmatmul.mubr.bf16.vlgmr.msra.gmra.mrb[4].mxu1 %v658_v35 }
 0x1cf   : > { %1315 = vmatpush3.bf16.msra.mxu1 %v1432_v34  ;;  %1330 = vmatprep.mubr.msk.bf16.mxu1 %vm1574_vm0, %v1573_v1 }
 0x1d0   : > { %1316 = vmatprep.subr.bf16.mxu1 %v1573_v1 }
 0x1d3   : > { %1317 = vmatpush3.bf16.msra.mxu1 %v1433_v37 }
 0x1d4   : > { %1318 = vmatprep.subr.bf16.mxu1 %v1573_v1 }
 0x1d7   : > { %1319 = vmatpush3.bf16.msra.mxu1 %v1434_v38 }
 0x1d8   : > { %1320 = vmatprep.subr.bf16.mxu1 %v1573_v1 }
 0x1db   : > { %1321 = vmatpush3.bf16.msra.mxu1 %v1435_v20 }
 0x1dc   : > { %1322 = vmatprep.subr.bf16.mxu1 %v1573_v1 }
 0x1df   : > { %1323 = vmatpush3.bf16.msra.mxu1 %v1436_v39 }
 0x1e0   : > { %1324 = vmatprep.subr.bf16.mxu1 %v1573_v1 }
 0x1e3   : > { %1325 = vmatpush3.bf16.msra.mxu1 %v1437_v40 }
 0x1e4   : > { %1326 = vmatprep.subr.bf16.mxu1 %v1573_v1 }
 0x1e7   : > { %1327 = vmatpush3.bf16.msra.mxu1 %v1438_v41 }
 0x1e8   : > { %1328 = vmatprep.subr.bf16.mxu1 %v1573_v1  ;;  %v1181_v1 = vld [vmem:[%s1887_s6] ss:$0 sm:$0xff] }
 0x1eb   : > { %1329 = vmatpush3.bf16.msra.mxu1 %v1439_v42 }
 0x1ee   : > { %1331 = vmatmul.mubr.bf16.vlgmr.msra.gmra.mrb[8].mxu1 %v905_v36 }
 0x29c   : > { %v872_v43 = vpop.f32.mrb[8].mxu0 }
 0x29d   : > { %v1312_v44 = vpop.f32.mrb[9].mxu0 }
 0x29e   : > { %v875_v45 = vpop.f32.mrb[10].mxu0 }
 0x29f   : > { %v1313_v46 = vpop.f32.mrb[11].mxu0 }
 0x2a1   : > { %v757_v47 = vpop.f32.mrb[4].mxu1 }
 0x2a2   : > { %v1292_v48 = vpop.f32.mrb[5].mxu1  ;;  %v879_v51 = vadd.f32 %v872_v43, %v757_v47 }
 0x2a3   : > { %v760_v49 = vpop.f32.mrb[6].mxu1 }
 0x2a4   : > { %v1293_v50 = vpop.f32.mrb[7].mxu1  ;;  %v880_v52 = vadd.f32 %v875_v45, %v760_v49 }
 0x2c1   : > { %v1005_v53 = vpop.f32.mrb[8].mxu1 }
 0x2c2   : > { %v1012_v54 = vadd.f32 %v1005_v53, %v879_v51  ;;  %v1332_v55 = vpop.f32.mrb[9].mxu1 }
 0x2c3   : > { %v1008_v56 = vpop.f32.mrb[10].mxu1 }
 0x2c4   : > { %v1025_v57 = vadd.f32 %v1181_v1, %v1012_v54  ;;  %v1013_v58 = vadd.f32 %v1008_v56, %v880_v52  ;;  %v1333_v59 = vpop.f32.mrb[11].mxu1 }
 0x2c6   : > { %v1027_v60 = vmax.f32 %v1025_v57, 0.0  ;;  %v1026_v61 = vadd.f32 %v1181_v1, %v1013_v58 }
 0x2c8   : > { %1029 = vst [vmem:[%s302_s20] sm:$0xff] %v1027_v60  ;;  %v1028_v62 = vmax.f32 %v1026_v61, 0.0 }
 0x2ca   : > { %1030 = vst [vmem:[%s302_s20 + $0x8] sm:$0xff] %v1028_v62 }
 0x2cb   : > { %1509 = shalt.err (!%p1506_p11)
}
 0x2cc   : > { %s1510_s19 = scalar_lea.hbm %s1836_s29, 256  ;;  %s1514_s18 = scalar_lea.hbm %s1888_s7, 512 }
 0x2cd   : > { %p1511_p13 = scmp.ne.s32.totalorder %s1836_s29, %s1510_s19  ;;  %p1515_p6 = scmp.lt.u32.totalorder %s1836_s29, %s1888_s7 }
 0x2ce   : > { %p1516_p9 = scmp.lt.u32.totalorder %s1514_s18, %s1510_s19  ;;  %p1518_p10 = scmp.lt.u32.totalorder %s1510_s19, %s1836_s29 }
 0x2cf   : > { %p1512_p5 = pnand %p1511_p13, %p1902_p1 }
 0x2d0   : > { %p1517_p12 = por %p1516_p9, %p1515_p6 }
 0x2d1   : > { %p1513_p0 = pneg %p1512_p5 }
 0x2d2   : > { %p1519_p2 = por %p1518_p10, %p1517_p12 }
 0x2d4   : > { %p1520_p3 = pnand %p1519_p2, %p1513_p0 }
 0x2d6   : > { %1523 = shalt.err (!%p1520_p3)
}
 0x2d7   : > { %s1576_s20 = smov 128   ;;  %s1577_s22 = smov 8  }
 0x2d8   : > { %1342 = dma.vmem_to_hbm [thread:$0]  (%p1902_p1), %s1838_s21, 256, %s1836_s29, %s1840_s8, %s1576_s20, %s1576_s20, %s1577_s22  }
 0x2d9 PF: > { %p1359_p4 = scmp.ge.s32.totalorder %s1566_s27, 2  ;;  %s1060_s23 = sand.u32 1, %s1554_s24  }
 0x2da   : > { %p1903_p7 = scmp.ne.s32.totalorder %s1894_s12, 0  ;;  %s1061_s28 = scalar_lea.sflag [#allocation5], %s1060_s23 }
 0x2dc   : > { %p1352_p8 = pnand %p1359_p4, %p1903_p7 }
 0x2de   : > { %1549 = dma.done.wait (!%p1352_p8), %s1061_s28, 256  }
 0x2df   : > { %1551 = vsyncadd (!%p1352_p8), %s1061_s28, 4294967040  ;;  %s1904_s9 = sld [smem:[#allocation12_spill]]  ;;  %p19_p11 = scmp.ge.s32.totalorder %s1643_s30, 4  }
 0x2e0   : > { %s1905_s24 = smov %s1558_s25  ;;  %s1906_s25 = smov %s1562_s26 }
 0x2e1   : > { %s1908_s27 = smov %s1643_s30  ;;  %21 = sbr.rel (!%p19_p11) target bundleno = 5 (0x5), region = 96 }
 0x2e5   : > { %s1907_s26 = smov %s1904_s9 }
 0x2e8   :  { %1066 = vsyncpa [#allocation4], 1 }
 0x2e9   :  { %1068 = vsyncpa [#allocation4 + $0x1], 1 }
 0x2ea   :  { %1069 = vsyncpa [#allocation7], 1 }
 0x2eb   :  { %1070 = vsyncpa [#allocation5], 1 }
 0x2ec   :  { %1072 = vsyncpa [#allocation5 + $0x1], 1 }

</bundles_post_ra>
